<compile_context>
chip_gen: v7x
topology: tpu7x:2x2x1
jax: 0.10.0
libtpu: 0.0.40
codegen_flags: <defaults>
</compile_context>

<pallas_src>
import jax
import jax.numpy as jnp
from jax.experimental import pallas as pl
from jax.experimental.pallas import tpu as pltpu


def _round_up(x, m):
    return ((x + m - 1) // m) * m


# ---------------------------------------------------------------------------
# Kernel 1: bulk input projection  gates_x = x @ W_ih^T + b  (all timesteps,
# fully parallel over the grid -> one big MXU-friendly matmul).
# ---------------------------------------------------------------------------
def proj_kernel(x_ref, wih_ref, b_ref, gx_ref):
    x = x_ref[...].astype(jnp.bfloat16)                        # (M_blk, H) bf16
    gx_ref[...] = (jnp.dot(x, wih_ref[...],
                           preferred_element_type=jnp.float32)
                   + b_ref[...])                               # (M_blk, 4H) f32


# ---------------------------------------------------------------------------
# Kernel 2: sequential LSTM recurrence. Only h @ W_hh^T sits on the serial
# critical path; T_BLK timesteps are unrolled per grid iteration.
# ---------------------------------------------------------------------------
def lstm_recurrence_kernel(gx_ref, whh_ref, h0_ref, c0_ref,
                           out_ref, hT_ref, cT_ref, h_sc, c_sc):
    t = pl.program_id(0)
    t_blk = gx_ref.shape[0]
    H = whh_ref.shape[0]

    @pl.when(t == 0)
    def _():
        h_sc[...] = h0_ref[...].astype(jnp.float32)
        c_sc[...] = c0_ref[...].astype(jnp.float32)

    h = h_sc[...]                                              # (B, H) f32
    c = c_sc[...]
    for j in range(t_blk):                                     # static unroll
        gates = gx_ref[j] + jnp.dot(h.astype(jnp.bfloat16), whh_ref[...],
                                    preferred_element_type=jnp.float32)
        i_g = jax.nn.sigmoid(gates[:, 0 * H:1 * H])
        f_g = jax.nn.sigmoid(gates[:, 1 * H:2 * H])
        g_g = jnp.tanh(gates[:, 2 * H:3 * H])
        o_g = jax.nn.sigmoid(gates[:, 3 * H:4 * H])
        c = f_g * c + i_g * g_g
        h = o_g * jnp.tanh(c)
        out_ref[j] = h.astype(out_ref.dtype)
    h_sc[...] = h
    c_sc[...] = c

    # Final-state writes only on the last grid step (saves 2 stores/step).
    @pl.when(t == pl.num_programs(0) - 1)
    def _():
        hT_ref[...] = h.astype(hT_ref.dtype)
        cT_ref[...] = c.astype(cT_ref.dtype)


def lstm_forward(x_emb, w_ih_t, w_hh_t, bias, h0, c0):
    """x_emb: (S, B, H) time-major, already padded (B%8==0, H%128==0).
    w_ih_t / w_hh_t: (H, 4H) bf16; bias: (1, 4H) f32; h0/c0: (B, H) f32.
    Returns (out (S,B,H), h_final (B,H), c_final (B,H)) in f32."""
    S, B, H = x_emb.shape
    G = 4 * H
    t_blk = next(b for b in (8, 4, 2, 1) if S % b == 0)
    m_blk = t_blk * B

    # ---- phase 1: one big batched projection over all S*B rows (parallel) ---
    x2d = x_emb.reshape(S * B, H)              # contiguous collapse: free
    gx2d = pl.pallas_call(
        proj_kernel,
        out_shape=jax.ShapeDtypeStruct((S * B, G), jnp.float32),
        grid_spec=pltpu.PrefetchScalarGridSpec(
            num_scalar_prefetch=0,
            grid=(S * B // m_blk,),
            in_specs=[
                pl.BlockSpec((m_blk, H), lambda i: (i, 0)),    # x rows
                pl.BlockSpec((H, G), lambda i: (0, 0)),        # W_ih^T (bf16)
                pl.BlockSpec((1, G), lambda i: (0, 0)),        # bias
            ],
            out_specs=pl.BlockSpec((m_blk, G), lambda i: (i, 0)),
        ),
        compiler_params=pltpu.CompilerParams(
            dimension_semantics=("parallel",)),
    )(x2d, w_ih_t, bias)
    gx = gx2d.reshape(S, B, G)                 # contiguous split: free

    # ---- phase 2: serial recurrence, t_blk steps per grid iteration ---------
    out_shapes = (
        jax.ShapeDtypeStruct((S, B, H), jnp.float32),
        jax.ShapeDtypeStruct((B, H), jnp.float32),
        jax.ShapeDtypeStruct((B, H), jnp.float32),
    )
    grid_spec = pltpu.PrefetchScalarGridSpec(
        num_scalar_prefetch=0,
        grid=(S // t_blk,),
        in_specs=[
            pl.BlockSpec((t_blk, B, G), lambda t: (t, 0, 0)),  # gates_x block
            # Grid-invariant weight: constant index map => fetched once.
            # (For large H on v7x, additionally use pipeline_mode=pl.Buffered(1)
            #  and an explicit vmem_limit_bytes to avoid double-buffering it.)
            pl.BlockSpec((H, G), lambda t: (0, 0)),            # W_hh^T (bf16)
            pl.BlockSpec((B, H), lambda t: (0, 0)),            # h0
            pl.BlockSpec((B, H), lambda t: (0, 0)),            # c0
        ],
        out_specs=[
            pl.BlockSpec((t_blk, B, H), lambda t: (t, 0, 0)),  # per-step h
            pl.BlockSpec((B, H), lambda t: (0, 0)),            # final h
            pl.BlockSpec((B, H), lambda t: (0, 0)),            # final c
        ],
        scratch_shapes=[
            pltpu.VMEM((B, H), jnp.float32),                   # running h
            pltpu.VMEM((B, H), jnp.float32),                   # running c
        ],
    )
    return pl.pallas_call(
        lstm_recurrence_kernel,
        out_shape=out_shapes,
        grid_spec=grid_spec,
        compiler_params=pltpu.CompilerParams(
            dimension_semantics=("arbitrary",)),
    )(gx, w_hh_t, h0, c0)


class EncoderRNN:
    """JAX/Pallas port of the PyTorch EncoderRNN (Embedding + 1-layer LSTM)."""

    def __init__(self, input_size, hidden_size, key):
        self.input_size = input_size
        self.hidden_size = hidden_size
        H = hidden_size
        self.H_pad = _round_up(H, 128)
        k = 1.0 / jnp.sqrt(jnp.float32(H))
        ke, k1, k2, k3, k4 = jax.random.split(key, 5)
        # nn.Embedding: N(0, 1)
        self.embedding = jax.random.normal(ke, (input_size, H), jnp.float32)
        # nn.LSTM params: U(-1/sqrt(H), 1/sqrt(H)), gate order [i, f, g, o]
        self.w_ih = jax.random.uniform(k1, (4 * H, H), jnp.float32, -k, k)
        self.w_hh = jax.random.uniform(k2, (4 * H, H), jnp.float32, -k, k)
        self.b_ih = jax.random.uniform(k3, (4 * H,), jnp.float32, -k, k)
        self.b_hh = jax.random.uniform(k4, (4 * H,), jnp.float32, -k, k)

        # ---- padded / pre-transposed kernel parameters ----
        Hp = self.H_pad
        self.emb_pad = jnp.pad(self.embedding, ((0, 0), (0, Hp - H)))
        self.w_ih_t_pad = self._pad_gates_t(self.w_ih, H, Hp).astype(jnp.bfloat16)
        self.w_hh_t_pad = self._pad_gates_t(self.w_hh, H, Hp).astype(jnp.bfloat16)
        bias = jnp.zeros((1, 4 * Hp), jnp.float32)
        b = self.b_ih + self.b_hh
        for g in range(4):
            bias = bias.at[0, g * Hp:g * Hp + H].set(b[g * H:(g + 1) * H])
        self.bias_pad = bias

    @staticmethod
    def _pad_gates_t(w, H, Hp):
        """(4H, H) PyTorch gate weights -> transposed, per-gate zero-padded
        (Hp, 4*Hp) so every gate slice is a lane-aligned multiple of 128."""
        out = jnp.zeros((Hp, 4 * Hp), jnp.float32)
        for g in range(4):
            out = out.at[:H, g * Hp:g * Hp + H].set(w[g * H:(g + 1) * H, :].T)
        return out

    def forward(self, tokens, hidden, cell_state):
        """tokens: (batch, seq) int32 ids; hidden/cell: (1, batch, hidden).
        Returns (output (seq,batch,hidden), new_hidden (1,batch,hidden),
                 cell_state (1,batch,hidden)) — same as the PyTorch module."""
        B, S = tokens.shape
        H, Hp = self.hidden_size, self.H_pad
        Bp = _round_up(B, 8)
        tokens_p = jnp.pad(tokens, ((0, Bp - B), (0, 0)))
        # Transpose the tiny (B,S) id matrix (not the activations) and gather
        # directly into the time-major layout the recurrence consumes.
        # TODO(synk): fuse the embedding gather into proj_kernel via
        # scalar-prefetch row-gather (pl.Element) to avoid materializing x_emb.
        x_emb = jnp.take(self.emb_pad, tokens_p.T, axis=0)     # (S, Bp, Hp)
        h0 = jnp.zeros((Bp, Hp), jnp.float32).at[:B, :H].set(hidden[0])
        c0 = jnp.zeros((Bp, Hp), jnp.float32).at[:B, :H].set(cell_state[0])
        out_p, hT_p, cT_p = lstm_forward(
            x_emb, self.w_ih_t_pad, self.w_hh_t_pad, self.bias_pad, h0, c0)
        out = out_p[:, :B, :H]
        return out, hT_p[:B, :H][None], cT_p[:B, :H][None]

    def get_initial_hidden_state(self, batch_size):
        return jnp.zeros((1, batch_size, self.hidden_size), jnp.float32)

    def get_initial_cell_state(self, batch_size):
        return jnp.zeros((1, batch_size, self.hidden_size), jnp.float32)


def _reference_forward(enc, tokens, h0, c0):
    """Pure-JAX reference mirroring the kernel math (bf16 matmul inputs with
    f32 accumulation; f32 gates and cell state)."""
    H = enc.hidden_size
    x = jnp.transpose(enc.embedding[tokens], (1, 0, 2))        # (S, B, H)
    w_ih_t = enc.w_ih.T.astype(jnp.bfloat16)
    w_hh_t = enc.w_hh.T.astype(jnp.bfloat16)
    b = (enc.b_ih + enc.b_hh).reshape(1, 4 * H)

    def step(carry, x_t):
        h, c = carry
        gates = (jnp.dot(x_t.astype(jnp.bfloat16), w_ih_t,
                         preferred_element_type=jnp.float32)
                 + jnp.dot(h.astype(jnp.bfloat16), w_hh_t,
                           preferred_element_type=jnp.float32)
                 + b)
        i = jax.nn.sigmoid(gates[:, 0 * H:1 * H])
        f = jax.nn.sigmoid(gates[:, 1 * H:2 * H])
        g = jnp.tanh(gates[:, 2 * H:3 * H])
        o = jax.nn.sigmoid(gates[:, 3 * H:4 * H])
        c_new = f * c + i * g
        h_new = o * jnp.tanh(c_new)
        return (h_new, c_new), h_new

    (h_f, c_f), outs = jax.lax.scan(step, (h0[0], c0[0]), x)
    return outs, h_f[None], c_f[None]


if __name__ == "__main__":
    VOCAB, HIDDEN, BATCH, SEQ = 16, 32, 2, 8

    key = jax.random.PRNGKey(0)
    k_params, k_tok = jax.random.split(key)
    enc = EncoderRNN(VOCAB, HIDDEN, k_params)

    tokens = jax.random.randint(k_tok, (BATCH, SEQ), 0, VOCAB, dtype=jnp.int32)
    h0 = enc.get_initial_hidden_state(BATCH)
    c0 = enc.get_initial_cell_state(BATCH)

    out, h_new, c_new = enc.forward(tokens, h0, c0)
    jax.block_until_ready((out, h_new, c_new))

    ref_out, ref_h, ref_c = _reference_forward(enc, tokens, h0, c0)
    assert out.shape == (SEQ, BATCH, HIDDEN)
    assert h_new.shape == (1, BATCH, HIDDEN) and c_new.shape == (1, BATCH, HIDDEN)
    assert jnp.allclose(out, ref_out, atol=1e-3, rtol=1e-3)
    assert jnp.allclose(h_new, ref_h, atol=1e-3, rtol=1e-3)
    assert jnp.allclose(c_new, ref_c, atol=1e-3, rtol=1e-3)

    print("KERNEL_OK")
</pallas_src>

<mosaic_0001>
module attributes {stable_mosaic.version = 11 : i64} {
  func.func @proj_kernel(%arg0: i32, %arg1: memref<64x128xf32, #tpu.memory_space<vmem>>, %arg2: memref<128x512xbf16, #tpu.memory_space<vmem>>, %arg3: memref<1x512xf32, #tpu.memory_space<vmem>>, %arg4: memref<64x512xf32, #tpu.memory_space<vmem>>) attributes {dimension_semantics = [#tpu.dimension_semantics<parallel>], iteration_bounds = array<i64: 1>, scalar_prefetch = 0 : i64, scratch_operands = 0 : i64, tpu.core_type = #tpu.core_type<tc>, window_params = [{transform_indices = @transform_0, window_bounds = array<i64: 64, 128>}, {pipeline_mode = #tpu.pipeline_mode<synchronous>, transform_indices = @transform_1, window_bounds = array<i64: 128, 512>}, {pipeline_mode = #tpu.pipeline_mode<synchronous>, transform_indices = @transform_2, window_bounds = array<i64: 1, 512>}, {transform_indices = @transform_3, window_bounds = array<i64: 64, 512>}]} {
    %c0 = arith.constant 0 : index
    %c0_0 = arith.constant 0 : index
    %0 = vector.load %arg1[%c0, %c0_0] : memref<64x128xf32, #tpu.memory_space<vmem>>, vector<64x128xf32>
    %1 = arith.truncf %0 : vector<64x128xf32> to vector<64x128xbf16>
    %c0_1 = arith.constant 0 : index
    %c0_2 = arith.constant 0 : index
    %2 = vector.load %arg2[%c0_1, %c0_2] : memref<128x512xbf16, #tpu.memory_space<vmem>>, vector<128x512xbf16>
    %cst = arith.constant dense<0.000000e+00> : vector<64x512xf32>
    %3 = tpu.matmul %1, %2, %cst {dimension_numbers = #tpu.dot_dimension_numbers<[1], [0], [0], [1], [0, 0, 1, 1], [], []>} : vector<64x128xbf16>, vector<128x512xbf16>, vector<64x512xf32> -> vector<64x512xf32>
    %c0_3 = arith.constant 0 : index
    %c0_4 = arith.constant 0 : index
    %4 = vector.load %arg3[%c0_3, %c0_4] : memref<1x512xf32, #tpu.memory_space<vmem>>, vector<1x512xf32>
    %5 = vector.broadcast %4 : vector<1x512xf32> to vector<64x512xf32>
    %6 = arith.addf %3, %5 : vector<64x512xf32>
    %c0_5 = arith.constant 0 : index
    %c0_6 = arith.constant 0 : index
    %7 = vector.load %arg4[%c0_5, %c0_6] : memref<64x512xf32, #tpu.memory_space<vmem>>, vector<64x512xf32>
    tpu.vector_store %arg4[%c0_5, %c0_6], %6 {strides = array<i32>} : memref<64x512xf32, #tpu.memory_space<vmem>>, vector<64x512xf32>,
    return
  }
  func.func @transform_0(%arg0: i32) -> (i32, i32) {
    %c0_i32 = arith.constant 0 : i32
    %c0_i32_0 = arith.constant 0 : i32
    return %arg0, %c0_i32 : i32, i32
  }
  func.func @transform_1(%arg0: i32) -> (i32, i32) {
    %c0_i32 = arith.constant 0 : i32
    %c0_i32_0 = arith.constant 0 : i32
    %c0_i32_1 = arith.constant 0 : i32
    return %c0_i32, %c0_i32_0 : i32, i32
  }
  func.func @transform_2(%arg0: i32) -> (i32, i32) {
    %c0_i32 = arith.constant 0 : i32
    %c0_i32_0 = arith.constant 0 : i32
    %c0_i32_1 = arith.constant 0 : i32
    return %c0_i32, %c0_i32_0 : i32, i32
  }
  func.func @transform_3(%arg0: i32) -> (i32, i32) {
    %c0_i32 = arith.constant 0 : i32
    %c0_i32_0 = arith.constant 0 : i32
    return %arg0, %c0_i32 : i32, i32
  }
}

</mosaic_0001>

<bundles_post_ra>
// kernel: tpu_custom_call.1
= control target key start
LH: loop header
LB: loop body
LE: loop exit
PB: predicated region body
PF: predicated region fallthrough
CT: control target
= control target key end

     0   :  { %8 = vsyncpa [#allocation3], 0  ;;  %s745_s0 = inlined_call_operand.hbm [shape: f32[64,128], index: 0, kind: input, shape index: {}]   ;;  %s746_s1 = inlined_call_operand.hbm [shape: bf16[128,512], index: 1, kind: input, shape index: {}]   ;;  %s747_s2 = inlined_call_operand.vmem [shape: f32[1,512], index: 2, kind: input, shape index: {}]   ;;  %s748_s3 = inlined_call_operand.hbm [shape: f32[64,512], index: 3, kind: output, shape index: {}]  }
   0x1   :  { %9 = vsyncpa [#allocation6], 0 }
   0x2   :  { %10 = vsyncpa [#allocation4], 0  ;;  %s628_s12 = smov [#allocation2]   ;;  %s556_s16 = scalar_lea.hbm %s745_s0, 1024 }
   0x3   :  { %s16_s13 = sshll.u32 %s628_s12, 4  ;;  %p557_p0 = scmp.ne.s32.totalorder %s745_s0, %s556_s16  ;;  %s17_s13 = int_to_ptr.vmem [resolvable:$true] %s16_s13 }
   0x4   :  { %p560_p1 = scmp.lt.u32.totalorder %s556_s16, %s745_s0 }
   0x6   :  { %p562_p2 = pnand %p560_p1, %p557_p0 }
   0x8   :  { %565 = shalt.err (!%p562_p2)
}
   0x9   :  { %s566_s21 = scalar_lea.vmem %s17_s13, 1024  ;;  %p571_p4 = scmp.lt.s32.totalorder %s17_s13, %s17_s13 }
   0xa   :  { %p567_p3 = scmp.ne.s32.totalorder %s17_s13, %s566_s21  ;;  %p572_p5 = scmp.lt.s32.totalorder %s566_s21, %s566_s21 }
   0xc   :  { %p573_p6 = por %p572_p5, %p571_p4 }
   0xe   :  { %p574_p7 = pnand %p573_p6, %p567_p3 }
  0x10   :  { %577 = shalt.err (!%p574_p7)
}
  0x11   :  { %s629_s22 = smov 128   ;;  %s630_s23 = smov 8  }
  0x12   :  { %22 = dma.hbm_to_vmem [thread:$0]  %s745_s0, 1024, %s17_s13, [#allocation3], %s629_s22, %s629_s22, %s630_s23  }
  0x13   :  { %s631_s26 = smov [#allocation5]   ;;  %s578_s30 = scalar_lea.hbm %s746_s1, 4096 }
  0x14   :  { %s28_s27 = sshll.u32 %s631_s26, 4  ;;  %p579_p8 = scmp.ne.s32.totalorder %s746_s1, %s578_s30  ;;  %s29_s27 = int_to_ptr.vmem [resolvable:$true] %s28_s27 }
  0x15   :  { %p582_p9 = scmp.lt.u32.totalorder %s578_s30, %s746_s1 }
  0x17   :  { %p584_p10 = pnand %p582_p9, %p579_p8 }
  0x19   :  { %587 = shalt.err (!%p584_p10)
}
  0x1a   :  { %s588_s8 = scalar_lea.vmem %s29_s27, 4096  ;;  %p593_p12 = scmp.lt.s32.totalorder %s29_s27, %s29_s27 }
  0x1b   :  { %p589_p11 = scmp.ne.s32.totalorder %s29_s27, %s588_s8  ;;  %p594_p13 = scmp.lt.s32.totalorder %s588_s8, %s588_s8 }
  0x1d   :  { %p595_p0 = por %p594_p13, %p593_p12 }
  0x1f   :  { %p596_p1 = pnand %p595_p0, %p589_p11 }
  0x21   :  { %599 = shalt.err (!%p596_p1)
}
  0x22   :  { %s632_s0 = smov 256   ;;  %s633_s9 = smov 16  }
  0x23   :  { %34 = dma.hbm_to_vmem [thread:$0]  %s746_s1, 4096, %s29_s27, [#allocation6], %s632_s0, %s632_s0, %s633_s9  }
  0x24   :  { %622 = dma.done.wait [#allocation3], 1024  }
  0x25   :  { %623 = vsyncadd [#allocation3], 4294966272 }
  0x26   :  { %624 = dma.done.wait [#allocation6], 4096  }
  0x27   :  { %625 = vsyncadd [#allocation6], 4294963200  ;;  %v634_v0 = vmov 0   ;;  %v508_v1 = vld [vmem:[#allocation5 + $0x4] ss:$16 sps:$4 sm:$0xff]   ;;  %v45_v34 = vld [vmem:[#allocation2 + $0x8] sm:$0xff]  ;;  %v90_v45 = vlaneseq }
  0x28   :  { %302 = vmatprep.mubr.bf16.mxu0 %v634_v0  ;;  %375 = vmatprep.mubr.bf16.mxu1 %v634_v0  ;;  %v510_v2 = vld [vmem:[#allocation5 + $0xc] ss:$16 sps:$4 sm:$0xff]   ;;  %v512_v3 = vld [vmem:[#allocation5] ss:$16 sps:$4 sm:$0xff]   ;;  %v513_v4 = vld [vmem:[#allocation5 + $0x8] ss:$16 sps:$4 sm:$0xff]  }
  0x29   :  { %270 = vmatprep.subr.bf16.mxu0 %v508_v1  ;;  %343 = vmatprep.subr.bf16.mxu1 %v510_v2  ;;  %v514_v5 = vld [vmem:[#allocation5 + $0x24] ss:$16 sps:$4 sm:$0xff]   ;;  %v516_v6 = vld [vmem:[#allocation5 + $0x2c] ss:$16 sps:$4 sm:$0xff]   ;;  %v518_v7 = vld [vmem:[#allocation5 + $0x20] ss:$16 sps:$4 sm:$0xff]  }
  0x2a   :  { %271 = vmatpush1.bf16.msra.mxu0 %v512_v3  ;;  %344 = vmatpush1.bf16.msra.mxu1 %v513_v4  ;;  %v519_v8 = vld [vmem:[#allocation5 + $0x28] ss:$16 sps:$4 sm:$0xff]   ;;  %v520_v9 = vld [vmem:[#allocation5 + $0x44] ss:$16 sps:$4 sm:$0xff]   ;;  %v522_v10 = vld [vmem:[#allocation5 + $0x4c] ss:$16 sps:$4 sm:$0xff]  }
  0x2b   :  { %272 = vmatprep.subr.bf16.mxu0 %v514_v5  ;;  %345 = vmatprep.subr.bf16.mxu1 %v516_v6  ;;  %v524_v11 = vld [vmem:[#allocation5 + $0x40] ss:$16 sps:$4 sm:$0xff]   ;;  %v525_v12 = vld [vmem:[#allocation5 + $0x48] ss:$16 sps:$4 sm:$0xff]   ;;  %v526_v13 = vld [vmem:[#allocation5 + $0x64] ss:$16 sps:$4 sm:$0xff]  }
  0x2c   :  { %v528_v14 = vld [vmem:[#allocation5 + $0x6c] ss:$16 sps:$4 sm:$0xff]   ;;  %v530_v15 = vld [vmem:[#allocation5 + $0x60] ss:$16 sps:$4 sm:$0xff]   ;;  %v531_v16 = vld [vmem:[#allocation5 + $0x68] ss:$16 sps:$4 sm:$0xff]  }
  0x2d   :  { %v532_v17 = vld [vmem:[#allocation5 + $0x84] ss:$16 sps:$4 sm:$0xff]   ;;  %v534_v18 = vld [vmem:[#allocation5 + $0x8c] ss:$16 sps:$4 sm:$0xff]   ;;  %v536_v19 = vld [vmem:[#allocation5 + $0x80] ss:$16 sps:$4 sm:$0xff]  }
  0x2e   :  { %273 = vmatpush1.bf16.msra.mxu0 %v518_v7  ;;  %346 = vmatpush1.bf16.msra.mxu1 %v519_v8  ;;  %v537_v20 = vld [vmem:[#allocation5 + $0x88] ss:$16 sps:$4 sm:$0xff]   ;;  %v538_v21 = vld [vmem:[#allocation5 + $0xa4] ss:$16 sps:$4 sm:$0xff]   ;;  %v540_v22 = vld [vmem:[#allocation5 + $0xac] ss:$16 sps:$4 sm:$0xff]  }
  0x2f   :  { %274 = vmatprep.subr.bf16.mxu0 %v520_v9  ;;  %347 = vmatprep.subr.bf16.mxu1 %v522_v10  ;;  %v542_v23 = vld [vmem:[#allocation5 + $0xa0] ss:$16 sps:$4 sm:$0xff]   ;;  %v543_v24 = vld [vmem:[#allocation5 + $0xa8] ss:$16 sps:$4 sm:$0xff]   ;;  %v544_v25 = vld [vmem:[#allocation5 + $0xc4] ss:$16 sps:$4 sm:$0xff]  }
  0x30   :  { %v546_v26 = vld [vmem:[#allocation5 + $0xcc] ss:$16 sps:$4 sm:$0xff]   ;;  %v548_v27 = vld [vmem:[#allocation5 + $0xc0] ss:$16 sps:$4 sm:$0xff]   ;;  %v549_v28 = vld [vmem:[#allocation5 + $0xc8] ss:$16 sps:$4 sm:$0xff]  }
  0x31   :  { %v550_v29 = vld [vmem:[#allocation5 + $0xe4] ss:$16 sps:$4 sm:$0xff]   ;;  %v552_v30 = vld [vmem:[#allocation5 + $0xec] ss:$16 sps:$4 sm:$0xff]   ;;  %v554_v31 = vld [vmem:[#allocation5 + $0xe0] ss:$16 sps:$4 sm:$0xff]  }
  0x32   :  { %275 = vmatpush1.bf16.msra.mxu0 %v524_v11  ;;  %348 = vmatpush1.bf16.msra.mxu1 %v525_v12  ;;  %v555_v32 = vld [vmem:[#allocation5 + $0xe8] ss:$16 sps:$4 sm:$0xff]   ;;  %v44_v33 = vld [vmem:[#allocation2] sm:$0xff]  ;;  %v46_v36 = vld [vmem:[#allocation2 + $0x10] sm:$0xff]  ;;  %v91_v46 = vshrl.u32 %v90_v45, 7 }
  0x33   :  { %276 = vmatprep.subr.bf16.mxu0 %v526_v13  ;;  %349 = vmatprep.subr.bf16.mxu1 %v528_v14  ;;  %v52_v35 = vpack.c.bf16 %v45_v34, %v44_v33  ;;  %v47_v37 = vld [vmem:[#allocation2 + $0x18] sm:$0xff]  ;;  %v48_v39 = vld [vmem:[#allocation2 + $0x20] sm:$0xff]  ;;  %v49_v40 = vld [vmem:[#allocation2 + $0x28] sm:$0xff] }
  0x34   :  { %v53_v38 = vpack.c.bf16 %v47_v37, %v46_v36  ;;  %v54_v41 = vpack.c.bf16 %v49_v40, %v48_v39  ;;  %v50_v42 = vld [vmem:[#allocation2 + $0x30] sm:$0xff]  ;;  %v51_v43 = vld [vmem:[#allocation2 + $0x38] sm:$0xff]  ;;  %v92_v47 = vsub.s32 0, %v91_v46  ;;  %v100_v48 = vsub.s32 2, %v91_v46  ;;  %v88_v49 = vld [vmem:[%s747_s2] sm:$0xf] }
  0x35   :  { %v55_v44 = vpack.c.bf16 %v51_v43, %v50_v42  ;;  %v96_v50 = vsub.s32 1, %v91_v46  ;;  %v104_v51 = vsub.s32 3, %v91_v46  ;;  %s635_s2 = smov [#allocation7]  }
  0x36   :  { %277 = vmatpush1.bf16.msra.mxu0 %v530_v15  ;;  %350 = vmatpush1.bf16.msra.mxu1 %v531_v16  ;;  %v693_v52 = vrot.slane %v88_v49, %v92_v47  ;;  %v695_v53 = vrot.slane %v88_v49, %v100_v48  ;;  %s453_s13 = sshll.u32 %s635_s2, 4  ;;  %s454_s13 = int_to_ptr.vmem [resolvable:$true] %s453_s13 }
  0x37   :  { %278 = vmatprep.subr.bf16.mxu0 %v532_v17  ;;  %351 = vmatprep.subr.bf16.mxu1 %v534_v18  ;;  %v697_v54 = vrot.slane %v88_v49, %v96_v50  ;;  %v699_v55 = vrot.slane %v88_v49, %v104_v51  ;;  %s600_s14 = scalar_lea.vmem %s454_s13, 4096  ;;  %p605_p3 = scmp.lt.s32.totalorder %s454_s13, %s454_s13 }
  0x38   :  { %p601_p2 = scmp.ne.s32.totalorder %s454_s13, %s600_s14  ;;  %p606_p4 = scmp.lt.s32.totalorder %s600_s14, %s600_s14 }
  0x3a   :  { %279 = vmatpush1.bf16.msra.mxu0 %v536_v19  ;;  %352 = vmatpush1.bf16.msra.mxu1 %v537_v20  ;;  %p607_p5 = por %p606_p4, %p605_p3 }
  0x3b   :  { %280 = vmatprep.subr.bf16.mxu0 %v538_v21  ;;  %353 = vmatprep.subr.bf16.mxu1 %v540_v22 }
  0x3c   :  { %p608_p6 = pnand %p607_p5, %p601_p2 }
  0x3e   :  { %281 = vmatpush1.bf16.msra.mxu0 %v542_v23  ;;  %354 = vmatpush1.bf16.msra.mxu1 %v543_v24 }
  0x3f   :  { %282 = vmatprep.subr.bf16.mxu0 %v544_v25  ;;  %355 = vmatprep.subr.bf16.mxu1 %v546_v26 }
  0x42   :  { %283 = vmatpush1.bf16.msra.mxu0 %v548_v27  ;;  %356 = vmatpush1.bf16.msra.mxu1 %v549_v28 }
  0x43   :  { %284 = vmatprep.subr.bf16.mxu0 %v550_v29  ;;  %357 = vmatprep.subr.bf16.mxu1 %v552_v30 }
  0x46   :  { %285 = vmatpush1.bf16.msra.mxu0 %v554_v31  ;;  %358 = vmatpush1.bf16.msra.mxu1 %v555_v32 }
  0x49   :  { %303 = vmatmul.mubr.bf16.vlgmr.msra.gmra.mrb[0].mxu0 %v52_v35  ;;  %376 = vmatmul.mubr.bf16.vlgmr.msra.gmra.mrb[0].mxu1 %v52_v35 }
  0x4a   :  { %312 = vmatprep.mubr.bf16.mxu0 %v634_v0  ;;  %385 = vmatprep.mubr.bf16.mxu1 %v634_v0 }
  0x51   :  { %313 = vmatmul.mubr.bf16.gmra.mrb[4].mxu0 %v53_v38  ;;  %386 = vmatmul.mubr.bf16.gmra.mrb[4].mxu1 %v53_v38 }
  0x52   :  { %322 = vmatprep.mubr.bf16.mxu0 %v634_v0  ;;  %395 = vmatprep.mubr.bf16.mxu1 %v634_v0 }
  0x59   :  { %323 = vmatmul.mubr.bf16.gmra.mrb[8].mxu0 %v54_v41  ;;  %396 = vmatmul.mubr.bf16.gmra.mrb[8].mxu1 %v54_v41 }
  0x5a   :  { %332 = vmatprep.mubr.bf16.mxu0 %v634_v0  ;;  %405 = vmatprep.mubr.bf16.mxu1 %v634_v0 }
  0x61   :  { %333 = vmatmul.mubr.bf16.gmra.mrb[12].mxu0 %v55_v44  ;;  %406 = vmatmul.mubr.bf16.gmra.mrb[12].mxu1 %v55_v44 }
 0x11c   :  { %v304_v56 = vpop.f32.mrb[0].mxu0  ;;  %v377_v57 = vpop.f32.mrb[0].mxu1 }
 0x11d   :  { %v305_v58 = vadd.f32 %v304_v56, %v693_v52  ;;  %v378_v59 = vadd.f32 %v377_v57, %v695_v53  ;;  %v306_v60 = vpop.f32.mrb[1].mxu0  ;;  %v379_v61 = vpop.f32.mrb[1].mxu1 }
 0x11e   :  { %v307_v62 = vadd.f32 %v306_v60, %v697_v54  ;;  %v380_v63 = vadd.f32 %v379_v61, %v699_v55  ;;  %v308_v0 = vpop.f32.mrb[2].mxu0  ;;  %v381_v1 = vpop.f32.mrb[2].mxu1 }
 0x11f   :  { %416 = vst [vmem:[#allocation7] sm:$0xff] %v305_v58  ;;  %418 = vst [vmem:[#allocation7 + $0x10] sm:$0xff] %v378_v59  ;;  %v309_v2 = vadd.f32 %v308_v0, %v693_v52  ;;  %v382_v3 = vadd.f32 %v381_v1, %v695_v53  ;;  %v310_v4 = vpop.f32.mrb[3].mxu0  ;;  %v383_v5 = vpop.f32.mrb[3].mxu1 }
 0x120   :  { %417 = vst [vmem:[#allocation7 + $0x8] sm:$0xff] %v307_v62  ;;  %419 = vst [vmem:[#allocation7 + $0x18] sm:$0xff] %v380_v63  ;;  %v311_v6 = vadd.f32 %v310_v4, %v697_v54  ;;  %v384_v7 = vadd.f32 %v383_v5, %v699_v55 }
 0x121   :  { %420 = vst [vmem:[#allocation7 + $0x20] sm:$0xff] %v309_v2  ;;  %422 = vst [vmem:[#allocation7 + $0x30] sm:$0xff] %v382_v3 }
 0x122   :  { %421 = vst [vmem:[#allocation7 + $0x28] sm:$0xff] %v311_v6  ;;  %423 = vst [vmem:[#allocation7 + $0x38] sm:$0xff] %v384_v7 }
 0x124   :  { %v314_v8 = vpop.f32.mrb[4].mxu0  ;;  %v387_v9 = vpop.f32.mrb[4].mxu1 }
 0x125   :  { %v315_v10 = vadd.f32 %v314_v8, %v693_v52  ;;  %v388_v11 = vadd.f32 %v387_v9, %v695_v53  ;;  %v316_v12 = vpop.f32.mrb[5].mxu0  ;;  %v389_v13 = vpop.f32.mrb[5].mxu1 }
 0x126   :  { %v317_v14 = vadd.f32 %v316_v12, %v697_v54  ;;  %v390_v15 = vadd.f32 %v389_v13, %v699_v55  ;;  %v318_v16 = vpop.f32.mrb[6].mxu0  ;;  %v391_v17 = vpop.f32.mrb[6].mxu1 }
 0x127   :  { %424 = vst [vmem:[#allocation7 + $0x40] sm:$0xff] %v315_v10  ;;  %426 = vst [vmem:[#allocation7 + $0x50] sm:$0xff] %v388_v11  ;;  %v319_v18 = vadd.f32 %v318_v16, %v693_v52  ;;  %v392_v19 = vadd.f32 %v391_v17, %v695_v53  ;;  %v320_v20 = vpop.f32.mrb[7].mxu0  ;;  %v393_v21 = vpop.f32.mrb[7].mxu1 }
 0x128   :  { %425 = vst [vmem:[#allocation7 + $0x48] sm:$0xff] %v317_v14  ;;  %427 = vst [vmem:[#allocation7 + $0x58] sm:$0xff] %v390_v15  ;;  %v321_v22 = vadd.f32 %v320_v20, %v697_v54  ;;  %v394_v23 = vadd.f32 %v393_v21, %v699_v55 }
 0x129   :  { %428 = vst [vmem:[#allocation7 + $0x60] sm:$0xff] %v319_v18  ;;  %430 = vst [vmem:[#allocation7 + $0x70] sm:$0xff] %v392_v19 }
 0x12a   :  { %429 = vst [vmem:[#allocation7 + $0x68] sm:$0xff] %v321_v22  ;;  %431 = vst [vmem:[#allocation7 + $0x78] sm:$0xff] %v394_v23 }
 0x12c   :  { %v324_v24 = vpop.f32.mrb[8].mxu0  ;;  %v397_v25 = vpop.f32.mrb[8].mxu1 }
 0x12d   :  { %v325_v26 = vadd.f32 %v324_v24, %v693_v52  ;;  %v398_v27 = vadd.f32 %v397_v25, %v695_v53  ;;  %v326_v28 = vpop.f32.mrb[9].mxu0  ;;  %v399_v29 = vpop.f32.mrb[9].mxu1 }
 0x12e   :  { %v327_v30 = vadd.f32 %v326_v28, %v697_v54  ;;  %v400_v31 = vadd.f32 %v399_v29, %v699_v55  ;;  %v328_v32 = vpop.f32.mrb[10].mxu0  ;;  %v401_v33 = vpop.f32.mrb[10].mxu1 }
 0x12f   :  { %432 = vst [vmem:[#allocation7 + $0x80] sm:$0xff] %v325_v26  ;;  %434 = vst [vmem:[#allocation7 + $0x90] sm:$0xff] %v398_v27  ;;  %v329_v34 = vadd.f32 %v328_v32, %v693_v52  ;;  %v402_v35 = vadd.f32 %v401_v33, %v695_v53  ;;  %v330_v36 = vpop.f32.mrb[11].mxu0  ;;  %v403_v37 = vpop.f32.mrb[11].mxu1 }
 0x130   :  { %433 = vst [vmem:[#allocation7 + $0x88] sm:$0xff] %v327_v30  ;;  %435 = vst [vmem:[#allocation7 + $0x98] sm:$0xff] %v400_v31  ;;  %v331_v38 = vadd.f32 %v330_v36, %v697_v54  ;;  %v404_v39 = vadd.f32 %v403_v37, %v699_v55 }
 0x131   :  { %436 = vst [vmem:[#allocation7 + $0xa0] sm:$0xff] %v329_v34  ;;  %438 = vst [vmem:[#allocation7 + $0xb0] sm:$0xff] %v402_v35 }
 0x132   :  { %437 = vst [vmem:[#allocation7 + $0xa8] sm:$0xff] %v331_v38  ;;  %439 = vst [vmem:[#allocation7 + $0xb8] sm:$0xff] %v404_v39 }
 0x134   :  { %v334_v40 = vpop.f32.mrb[12].mxu0  ;;  %v407_v41 = vpop.f32.mrb[12].mxu1 }
 0x135   :  { %v335_v42 = vadd.f32 %v334_v40, %v693_v52  ;;  %v408_v43 = vadd.f32 %v407_v41, %v695_v53  ;;  %v336_v44 = vpop.f32.mrb[13].mxu0  ;;  %v409_v45 = vpop.f32.mrb[13].mxu1 }
 0x136   :  { %v337_v46 = vadd.f32 %v336_v44, %v697_v54  ;;  %v410_v47 = vadd.f32 %v409_v45, %v699_v55  ;;  %v338_v48 = vpop.f32.mrb[14].mxu0  ;;  %v411_v49 = vpop.f32.mrb[14].mxu1 }
 0x137   :  { %440 = vst [vmem:[#allocation7 + $0xc0] sm:$0xff] %v335_v42  ;;  %442 = vst [vmem:[#allocation7 + $0xd0] sm:$0xff] %v408_v43  ;;  %v339_v50 = vadd.f32 %v338_v48, %v693_v52  ;;  %v412_v51 = vadd.f32 %v411_v49, %v695_v53  ;;  %v340_v56 = vpop.f32.mrb[15].mxu0  ;;  %v413_v57 = vpop.f32.mrb[15].mxu1 }
 0x138   :  { %441 = vst [vmem:[#allocation7 + $0xc8] sm:$0xff] %v337_v46  ;;  %443 = vst [vmem:[#allocation7 + $0xd8] sm:$0xff] %v410_v47  ;;  %v341_v58 = vadd.f32 %v340_v56, %v697_v54  ;;  %v414_v59 = vadd.f32 %v413_v57, %v699_v55 }
 0x139   :  { %444 = vst [vmem:[#allocation7 + $0xe0] sm:$0xff] %v339_v50  ;;  %446 = vst [vmem:[#allocation7 + $0xf0] sm:$0xff] %v412_v51 }
 0x13a   :  { %445 = vst [vmem:[#allocation7 + $0xe8] sm:$0xff] %v341_v58  ;;  %447 = vst [vmem:[#allocation7 + $0xf8] sm:$0xff] %v414_v59 }
 0x13b   :  { %611 = shalt.err (!%p608_p6)
}
 0x13c   :  { %s612_s17 = scalar_lea.hbm %s748_s3, 4096 }
 0x13d   :  { %p613_p7 = scmp.ne.s32.totalorder %s748_s3, %s612_s17  ;;  %p616_p8 = scmp.lt.u32.totalorder %s612_s17, %s748_s3 }
 0x13f   :  { %p618_p9 = pnand %p616_p8, %p613_p7 }
 0x141   :  { %621 = shalt.err (!%p618_p9)
}
 0x142   :  { %s636_s22 = smov 512   ;;  %s637_s23 = smov 32  }
 0x143   :  { %459 = dma.vmem_to_hbm [thread:$0]  %s454_s13, 4096, %s748_s3, [#allocation4], %s636_s22, %s636_s22, %s637_s23  }
 0x144   :  { %626 = dma.done.wait [#allocation4], 4096  }
 0x145   :  { %627 = vsyncadd [#allocation4], 4294963200 }
 0x146   :  { %463 = vsyncpa [#allocation3], 1 }
 0x147   :  { %464 = vsyncpa [#allocation6], 1 }
 0x148   :  { %465 = vsyncpa [#allocation4], 1 }

</bundles_post_ra>
